<compile_context>
chip_gen: v5e
topology: v5e:2x2
jax: 0.10.0
libtpu: 0.0.40
codegen_flags: <defaults>
</compile_context>

<pallas_src>
import numpy as np
import jax
import jax.numpy as jnp
from jax import lax
from jax.experimental import pallas as pl
from jax.experimental.pallas import tpu as pltpu


def _selection_map(C, k, center):
    """Per output channel: (source channel, ki, kj) selected by the torch
    view(B,k,k,-1)[:, center, center, :] chain (unfold rows are c*k*k+ki*k+kj)."""
    sel = []
    for c_out in range(C):
        row = center * (k + 1) * C + c_out
        c_sel = row // (k * k)
        rem = row % (k * k)
        sel.append((c_sel, rem // k, rem % k))
    return sel


def _vmem_capacity():
    try:
        cap = int(pltpu.get_tpu_info().vmem_capacity_bytes)
        if cap > 0:
            return cap
    except Exception:
        pass
    return 64 * 1024 * 1024        # v7x per-TC physical VMEM (smallest generation)


def _compiler_params(block_bytes, const_bytes, cap):
    # double-buffered in+out blocks + resident constants + margin
    est = 2 * block_bytes + const_bytes + (2 << 20)
    kwargs = dict(dimension_semantics=("parallel",))
    if est > (16 << 20):           # v5e scoped-VMEM default
        kwargs["vmem_limit_bytes"] = int(min(est + (4 << 20), cap))
    return pltpu.CompilerParams(**kwargs)


def _pick_tb(B, per_batch_bytes, cap):
    """Largest divisor of B that (a) leaves >= 2 grid steps when B >= 2 (both
    v7x TensorCores get work) and (b) keeps double-buffered blocks inside a
    conservative VMEM budget (v7x: 64 MiB/TC, v5e/v6e: 128 MiB)."""
    budget = max(min(cap // 2, 48 << 20) - (6 << 20), 4 << 20)
    tb_cap = max(1, B // 2)
    tb = 1
    for d in range(1, B + 1):
        if B % d == 0 and d <= tb_cap and 2 * d * per_batch_bytes <= budget:
            tb = d
    return tb


def _make_fast_kernel(tb, C, W, lane_lo, m0, n_rows, pre, post, h_out, w_out,
                      ox_lo, n_cols, compute_dtype, precision):
    need_col_mask = n_cols < w_out

    def kernel(x_ref, dc_ref, o_ref):
        # x_ref:  (tb, C, Hs, L) with L = W (phase already selected by the DMA)
        #         or L = stride*W (phase selected by the free lane slice below).
        # dc_ref: (W, w_out) one-hot column selector.
        # o_ref:  (tb, C, h_out, w_out)
        x = x_ref[:, :, m0:m0 + n_rows, lane_lo:lane_lo + W]     # (tb,C,n_rows,W)
        xm = x.reshape(tb * C * n_rows, W).astype(compute_dtype)
        t = jnp.dot(xm, dc_ref[...], preferred_element_type=jnp.float32,
                    precision=precision)                          # (tb*C*n_rows, w_out)
        t = t.reshape(tb, C, n_rows, w_out)
        if need_col_mask:
            ox = lax.broadcasted_iota(jnp.int32, t.shape, 3)
            t = jnp.where((ox >= ox_lo) & (ox < ox_lo + n_cols), t, -1.0)
        o_ref[:, :, pre:pre + n_rows, :] = t.astype(o_ref.dtype)
        if pre:
            o_ref[:, :, 0:pre, :] = jnp.full((tb, C, pre, w_out), -1, o_ref.dtype)
        if post:
            o_ref[:, :, pre + n_rows:h_out, :] = jnp.full((tb, C, post, w_out),
                                                          -1, o_ref.dtype)

    return kernel


def _make_general_kernel(chan_sel, precision):
    def kernel(x_ref, drt_ref, dc_ref, bias_ref, o_ref):
        # x_ref: (1, C, H, W); drt: (n_ki, h_out, H); dc: (n_kj, W, w_out);
        # bias: (n_pair, h_out, w_out); o_ref: (1, C, h_out, w_out)
        for c_out, (c_sel, ir, ic, ib) in enumerate(chan_sel):
            x_c = x_ref[0, c_sel, :, :].astype(jnp.float32)
            t = jnp.dot(x_c, dc_ref[ic, :, :], preferred_element_type=jnp.float32,
                        precision=precision)
            out = jnp.dot(drt_ref[ir, :, :], t, preferred_element_type=jnp.float32,
                          precision=precision)
            out = out + bias_ref[ib, :, :]
            o_ref[0, c_out, :, :] = out.astype(o_ref.dtype)

    return kernel


def center_pool(mask, kernel_size=1, stride=2, padding=0, *, precision=None):
    """JAX/Pallas equivalent of CenterPool.forward (NCHW).

    precision: matmul precision of the one-hot MXU gather.  None (default)
    resolves to HIGHEST for float32 masks (bit-exact for arbitrary float
    values) and DEFAULT for bfloat16 masks (already exact).  Integer-valued
    float32 masks (the usual label case) may pass lax.Precision.DEFAULT to cut
    MXU passes ~3x on v5e; the kernel stays HBM-bound either way.
    """
    k = int(kernel_size)
    s = int(stride)
    p = int(padding)
    B, C, H, W = mask.shape
    h_out = int((H + 2 * p - (k - 1) - 1) / s + 1)
    w_out = int((W + 2 * p - (k - 1) - 1) / s + 1)
    center = k // 2
    if h_out <= 0 or w_out <= 0:
        return jnp.full((B, C, max(h_out, 0), max(w_out, 0)), -1, mask.dtype)

    sel = _selection_map(C, k, center)
    pairs = sorted({(ki, kj) for (_, ki, kj) in sel})
    identity = all(c_sel == c_out for c_out, (c_sel, _, _) in enumerate(sel))

    if precision is None:
        precision = (lax.Precision.HIGHEST if mask.dtype == jnp.float32
                     else lax.Precision.DEFAULT)
    compute_dtype = (mask.dtype if mask.dtype in (jnp.bfloat16, jnp.float32)
                     else jnp.float32)

    itemsize = jnp.dtype(mask.dtype).itemsize
    cap = _vmem_capacity()

    fast = (len(pairs) == 1) and identity and (H % s == 0)

    if fast:
        _, ki, kj = sel[0]
        y0, x0 = ki - p, kj - p
        oy_ok = [oy for oy in range(h_out) if 0 <= y0 + oy * s < H]
        ox_ok = [ox for ox in range(w_out) if 0 <= x0 + ox * s < W]
        if not oy_ok or not ox_ok:   # every centre sample lands in the -1 pad
            return jnp.full((B, C, h_out, w_out), -1, mask.dtype)
        oy_lo, n_rows = oy_ok[0], len(oy_ok)
        ox_lo, n_cols = ox_ok[0], len(ox_ok)
        y_first = y0 + oy_lo * s
        phase, m0 = y_first % s, y_first // s
        pre, post = oy_lo, h_out - oy_lo - n_rows
        Hs = H // s

        # Skip the unread stride rows at the DMA level when the lane width
        # allows a conforming block (W % 128 == 0); otherwise the phase pick is
        # a free static lane slice on the already-resident block.
        preslice = s > 1 and W % 128 == 0
        x_in = mask.reshape(B, C, Hs, s * W)        # free metadata reshape
        in_last = W if preslice else s * W
        lane_lo = 0 if preslice else phase * W
        in_index = ((lambda b: (b, 0, 0, phase)) if preslice
                    else (lambda b: (b, 0, 0, 0)))

        # One-hot column selector (exact 0/1 in the compute dtype).
        dc_np = np.zeros((W, w_out), np.float32)
        for ox in range(ox_lo, ox_lo + n_cols):
            dc_np[x0 + ox * s, ox] = 1.0
        dc = jnp.asarray(dc_np, dtype=compute_dtype)

        per_batch = C * (Hs * in_last + h_out * w_out) * itemsize
        tb = _pick_tb(B, per_batch, cap)
        grid = (B // tb,)

        kernel = _make_fast_kernel(tb, C, W, lane_lo, m0, n_rows, pre, post,
                                   h_out, w_out, ox_lo, n_cols,
                                   compute_dtype, precision)
        out = pl.pallas_call(
            kernel,
            out_shape=jax.ShapeDtypeStruct((B, C, h_out, w_out), mask.dtype),
            grid=grid,
            in_specs=[
                pl.BlockSpec((tb, C, Hs, in_last), in_index),
                pl.BlockSpec((W, w_out), lambda b: (0, 0)),
            ],
            out_specs=pl.BlockSpec((tb, C, h_out, w_out), lambda b: (b, 0, 0, 0)),
            compiler_params=_compiler_params(tb * per_batch, dc_np.nbytes, cap),
        )(x_in, dc)
        return out

    # ---- general fallback: C > 1 and k > 1 (channel-mixing view) or H % s != 0.
    ki_list = sorted({ki for (_, ki, _) in sel})
    kj_list = sorted({kj for (_, _, kj) in sel})
    ki_idx = {v: i for i, v in enumerate(ki_list)}
    kj_idx = {v: i for i, v in enumerate(kj_list)}
    pair_idx = {v: i for i, v in enumerate(pairs)}
    chan_sel = tuple((c_sel, ki_idx[ki], kj_idx[kj], pair_idx[(ki, kj)])
                     for (c_sel, ki, kj) in sel)

    drt_np = np.zeros((len(ki_list), h_out, H), np.float32)
    for i, ki in enumerate(ki_list):
        for oy in range(h_out):
            y = ki + oy * s - p
            if 0 <= y < H:
                drt_np[i, oy, y] = 1.0
    dc_np = np.zeros((len(kj_list), W, w_out), np.float32)
    for i, kj in enumerate(kj_list):
        for ox in range(w_out):
            x = kj + ox * s - p
            if 0 <= x < W:
                dc_np[i, x, ox] = 1.0
    bias_np = np.zeros((len(pairs), h_out, w_out), np.float32)
    for i, (ki, kj) in enumerate(pairs):
        row_ok = np.array([0 <= ki + oy * s - p < H for oy in range(h_out)])
        col_ok = np.array([0 <= kj + ox * s - p < W for ox in range(w_out)])
        bias_np[i][~(row_ok[:, None] & col_ok[None, :])] = -1.0

    drt = jnp.asarray(drt_np)
    dc = jnp.asarray(dc_np)
    bias = jnp.asarray(bias_np)
    const_bytes = drt_np.nbytes + dc_np.nbytes + bias_np.nbytes
    per_batch = C * (H * W + h_out * w_out) * itemsize

    kernel = _make_general_kernel(chan_sel, precision)
    out = pl.pallas_call(
        kernel,
        out_shape=jax.ShapeDtypeStruct((B, C, h_out, w_out), mask.dtype),
        grid=(B,),
        in_specs=[
            pl.BlockSpec((1, C, H, W), lambda b: (b, 0, 0, 0)),
            pl.BlockSpec(drt.shape, lambda b: (0, 0, 0)),
            pl.BlockSpec(dc.shape, lambda b: (0, 0, 0)),
            pl.BlockSpec(bias.shape, lambda b: (0, 0, 0)),
        ],
        out_specs=pl.BlockSpec((1, C, h_out, w_out), lambda b: (b, 0, 0, 0)),
        compiler_params=_compiler_params(per_batch, const_bytes, cap),
    )(mask, drt, dc, bias)
    return out


def _ref_center_pool(x, k, stride, padding):
    """Pure-numpy reimplementation of the torch forward (explicit unfold)."""
    B, C, H, W = x.shape
    xp = np.pad(x, ((0, 0), (0, 0), (padding, padding), (padding, padding)),
                mode="constant", constant_values=-1.0)
    Hp, Wp = xp.shape[2], xp.shape[3]
    h_out = int((H + 2 * padding - (k - 1) - 1) / stride + 1)
    w_out = int((W + 2 * padding - (k - 1) - 1) / stride + 1)
    lh = (Hp - k) // stride + 1
    lw = (Wp - k) // stride + 1
    L = lh * lw
    unf = np.zeros((B, C * k * k, L), dtype=x.dtype)
    col = 0
    for oy in range(lh):
        for ox in range(lw):
            patch = xp[:, :, oy * stride:oy * stride + k,
                       ox * stride:ox * stride + k].reshape(B, C * k * k)
            unf[:, :, col] = patch
            col += 1
    patched = unf.reshape(B, k, k, -1)
    center = k // 2
    pooled = patched[:, center, center, :]
    return pooled.reshape(B, C, h_out, w_out)


if __name__ == "__main__":
    key = jax.random.PRNGKey(0)
    k1, k2, k3, k4 = jax.random.split(key, 4)

    def make_mask(kk, shape):
        # Small integer labels plus -1 "ignore", as the module is used on masks.
        return jax.random.randint(kk, shape, -1, 5).astype(jnp.float32)

    # 1) module defaults (k=1, stride=2, padding=0): fast path, no border.
    x1 = make_mask(k1, (2, 4, 16, 16))
    out1 = jax.block_until_ready(center_pool(x1, 1, 2, 0))
    np.testing.assert_array_equal(np.asarray(out1),
                                  _ref_center_pool(np.asarray(x1), 1, 2, 0))

    # 2) k=3, stride=2, padding=1, single-channel mask: fast path, interior.
    x2 = make_mask(k2, (2, 1, 16, 16))
    out2 = jax.block_until_ready(center_pool(x2, 3, 2, 1))
    np.testing.assert_array_equal(np.asarray(out2),
                                  _ref_center_pool(np.asarray(x2), 3, 2, 1))

    # 3) k=1, stride=2, padding=1: fast path with -1 pad rows/cols.
    x3 = make_mask(k3, (2, 2, 16, 16))
    out3 = jax.block_until_ready(center_pool(x3, 1, 2, 1))
    np.testing.assert_array_equal(np.asarray(out3),
                                  _ref_center_pool(np.asarray(x3), 1, 2, 1))

    # 4) C>1 and k>1 (channel-mixing corner of the torch view): fallback path.
    x4 = make_mask(k4, (2, 2, 16, 16))
    out4 = jax.block_until_ready(center_pool(x4, 3, 2, 1))
    np.testing.assert_array_equal(np.asarray(out4),
                                  _ref_center_pool(np.asarray(x4), 3, 2, 1))

    # 5) bf16 mask on the default config: native bf16 single-pass MXU path.
    x5 = x1.astype(jnp.bfloat16)
    out5 = jax.block_until_ready(center_pool(x5, 1, 2, 0))
    np.testing.assert_array_equal(np.asarray(out5).astype(np.float32),
                                  _ref_center_pool(np.asarray(x1), 1, 2, 0))

    print("KERNEL_OK")
</pallas_src>

<mosaic_0001>
module attributes {stable_mosaic.version = 11 : i64} {
  func.func @kernel(%arg0: i32, %arg1: memref<1x4x8x32xf32, #tpu.memory_space<vmem>>, %arg2: memref<16x8xf32, #tpu.memory_space<vmem>>, %arg3: memref<1x4x8x8xf32, #tpu.memory_space<vmem>>) attributes {dimension_semantics = [#tpu.dimension_semantics<parallel>], iteration_bounds = array<i64: 2>, scalar_prefetch = 0 : i64, scratch_operands = 0 : i64, tpu.core_type = #tpu.core_type<tc>, window_params = [{transform_indices = @transform_0, window_bounds = array<i64: 1, 4, 8, 32>}, {pipeline_mode = #tpu.pipeline_mode<synchronous>, transform_indices = @transform_1, window_bounds = array<i64: 16, 8>}, {transform_indices = @transform_2, window_bounds = array<i64: 1, 4, 8, 8>}]} {
    %c0 = arith.constant 0 : index
    %c0_0 = arith.constant 0 : index
    %c0_1 = arith.constant 0 : index
    %c0_2 = arith.constant 0 : index
    %0 = vector.load %arg1[%c0, %c0_0, %c0_1, %c0_2] : memref<1x4x8x32xf32, #tpu.memory_space<vmem>>, vector<1x4x8x16xf32>
    %1 = vector.shape_cast %0 : vector<1x4x8x16xf32> to vector<32x16xf32>
    %c0_3 = arith.constant 0 : index
    %c0_4 = arith.constant 0 : index
    %2 = vector.load %arg2[%c0_3, %c0_4] : memref<16x8xf32, #tpu.memory_space<vmem>>, vector<16x8xf32>
    %cst = arith.constant dense<0.000000e+00> : vector<32x8xf32>
    %3 = tpu.matmul %1, %2, %cst {dimension_numbers = #tpu.dot_dimension_numbers<[1], [0], [0], [1], [0, 0, 1, 1], [], []>, precision = #tpu.contract_precision<fp32>} : vector<32x16xf32>, vector<16x8xf32>, vector<32x8xf32> -> vector<32x8xf32>
    %4 = vector.shape_cast %3 : vector<32x8xf32> to vector<1x4x8x8xf32>
    %c0_5 = arith.constant 0 : index
    %c0_6 = arith.constant 0 : index
    %c0_7 = arith.constant 0 : index
    %c0_8 = arith.constant 0 : index
    %5 = vector.load %arg3[%c0_5, %c0_6, %c0_7, %c0_8] : memref<1x4x8x8xf32, #tpu.memory_space<vmem>>, vector<1x4x8x8xf32>
    tpu.vector_store %arg3[%c0_5, %c0_6, %c0_7, %c0_8], %4 {strides = array<i32>} : memref<1x4x8x8xf32, #tpu.memory_space<vmem>>, vector<1x4x8x8xf32>,
    return
  }
  func.func @transform_0(%arg0: i32) -> (i32, i32, i32, i32) {
    %c0_i32 = arith.constant 0 : i32
    %c0_i32_0 = arith.constant 0 : i32
    %c0_i32_1 = arith.constant 0 : i32
    %c0_i32_2 = arith.constant 0 : i32
    return %arg0, %c0_i32, %c0_i32_0, %c0_i32_1 : i32, i32, i32, i32
  }
  func.func @transform_1(%arg0: i32) -> (i32, i32) {
    %c0_i32 = arith.constant 0 : i32
    %c0_i32_0 = arith.constant 0 : i32
    %c0_i32_1 = arith.constant 0 : i32
    return %c0_i32, %c0_i32_0 : i32, i32
  }
  func.func @transform_2(%arg0: i32) -> (i32, i32, i32, i32) {
    %c0_i32 = arith.constant 0 : i32
    %c0_i32_0 = arith.constant 0 : i32
    %c0_i32_1 = arith.constant 0 : i32
    %c0_i32_2 = arith.constant 0 : i32
    return %arg0, %c0_i32, %c0_i32_0, %c0_i32_1 : i32, i32, i32, i32
  }
}

</mosaic_0001>

<bundles_post_ra>
// kernel: tpu_custom_call.1
= control target key start
LH: loop header
LB: loop body
LE: loop exit
PB: predicated region body
PF: predicated region fallthrough
CT: control target
= control target key end

     0   :  { %7 = vsyncpa [#allocation3], 0  ;;  %s870_s0 = inlined_call_operand.hbm [shape: f32[2,4,8,32], index: 0, kind: input, shape index: {}]   ;;  %s871_s1 = inlined_call_operand.vmem [shape: f32[16,8], index: 1, kind: input, shape index: {}]   ;;  %s872_s2 = inlined_call_operand.hbm [shape: f32[2,4,8,8], index: 2, kind: output, shape index: {}]  }
   0x1   :  { %9 = vsyncpa [#allocation3 + $0x1], 0 }
   0x2   :  { %10 = vsyncpa [#allocation4], 0 }
   0x3   :  { %12 = vsyncpa [#allocation4 + $0x1], 0  ;;  %s716_s9 = smov 0   ;;  %s718_s10 = smov 0  }
   0x4   :  { %s720_s11 = smov 0   ;;  %s722_s12 = smov 0  }
   0x5 LB: > { %s737_s13 = sadd.s32 4294967295, %s695_s12   ;;  %s529_s14 = sadd.s32 4294967294, %s695_s12   ;;  %s695_s12 = sphi %s722_s12, %s882_s12   ;;  %s691_s11 = sphi %s720_s11, %s881_s11   ;;  %s687_s10 = sphi %s718_s10, %s880_s10   ;;  %s683_s9 = sphi %s716_s9, %s879_s9  }
   0x6   : > { %s741_s15 = sadd.s32 1, %s695_s12   ;;  %s25_s16 = sadd.s32 1, %s691_s11 }
   0x7   : > { %s22_s17 = ssub.s32 %s695_s12, %s741_s15  ;;  %p32_p0 = scmp.ne.s32.totalorder %s691_s11, %s687_s10 }
   0x8   : > { %p23_p1 = scmp.eq.s32.totalorder %s22_s17, 0  ;;  %p33_p2 = scmp.eq.s32.totalorder %s695_s12, 0 }
   0x9   : > { %p38_p3 = scmp.ne.s32.totalorder %s687_s10, %s683_s9  ;;  %p39_p4 = scmp.eq.s32.totalorder %s737_s13, 0 }
   0xa   : > { %s753_s18 = scalar_select %p23_p1, %s691_s11, %s25_s16  }
   0xb   : > { %p755_p5 = por %p33_p2, %p32_p0  ;;  %p759_p6 = por %p39_p4, %p38_p3 }
   0xc   : > { %p83_p7 = scmp.eq.s32.totalorder %s737_s13, 1  ;;  %p89_p8 = scmp.eq.s32.totalorder %s529_s14, 1 }
   0xd   : > { %p561_p10 = scmp.lt.s32.totalorder %s695_s12, 2  ;;  %s112_s23 = sand.u32 1, %s691_s11  }
   0xe   : > { %p766_p11 = por %p83_p7, %p32_p0  ;;  %p770_p12 = por %p89_p8, %p38_p3 }
   0xf   : > { %s543_s24 = sshll.u32 %s695_s12, 5  ;;  %s532_s25 = sshll.u32 %s112_s23, 5 }
  0x10   : > { %s121_s28 = scalar_lea.hbm %s870_s0, %s543_s24  ;;  %s116_s30 = scalar_lea.vmem [#allocation2], %s532_s25 }
  0x11   : > { %s122_s29 = sshll.u32 %s121_s28, 4  ;;  %s124_s3 = sshll.u32 %s116_s30, 4  ;;  %s123_s29 = int_to_ptr.hbm [resolvable:$true] %s122_s29  ;;  %s125_s3 = int_to_ptr.vmem [resolvable:$true] %s124_s3 }
  0x12   : > { %p781_p13 = pnand %p561_p10, %p755_p5  ;;  %p535_p0 = scmp.ge.s32.totalorder %s695_s12, 1 }
  0x13   : > { %p132_p1 = scmp.lt.s32.totalorder %s695_s12, 3  ;;  %s113_s5 = scalar_lea.sflag [#allocation3], %s112_s23 }
  0x14   : > { %s599_s6 = sshra.s32 %s123_s29, 4  ;;  %p603_p3 = pneg %p781_p13  ;;  %s600_s6 = int_to_ptr.hbm [resolvable:$true] %s599_s6 }
  0x15   : > { %s601_s7 = scalar_lea.hbm %s600_s6, 32  ;;  %s606_s16 = scalar_lea.hbm %s870_s0, 64 }
  0x16   : > { %p602_p2 = scmp.ne.s32.totalorder %s600_s6, %s601_s7  ;;  %p607_p5 = scmp.lt.s32.totalorder %s600_s6, %s870_s0 }
  0x17   : > { %p608_p8 = scmp.lt.s32.totalorder %s606_s16, %s601_s7 }
  0x18   : > { %p604_p4 = pnand %p603_p3, %p602_p2 }
  0x19   : > { %p609_p10 = por %p608_p8, %p607_p5 }
  0x1a   : > { %p605_p7 = pneg %p604_p4 }
  0x1c   : > { %p610_p9 = pnand %p609_p10, %p605_p7 }
  0x1e   : > { %613 = shalt.err (!%p610_p9)
}
  0x1f   : > { %s697_s23 = smov 128   ;;  %s698_s24 = smov 8  }
  0x20   : > { %556 = dma.hbm_to_vmem [thread:$0]  (!%p781_p13), %s123_s29, 512, %s125_s3, %s113_s5, %s697_s23, %s697_s23, %s698_s24  }
  0x21   : > { %p133_p2 = pnand %p535_p0, %p132_p1 }
  0x22   : > { %s802_s25 = sand.u32 (!%p133_p2), 1, %s687_s10  }
  0x23   : > { %136 = sbr.rel (%p133_p2) target bundleno = 238 (0xee), region = 28  ;;  %s536_s26 = sshll.u32 (!%p133_p2), %s802_s25, 5 }
  0x24   : > { %s139_s27 = scalar_lea.sflag (!%p133_p2), [#allocation3], %s802_s25  ;;  %s142_s28 = scalar_lea.vmem (!%p133_p2), [#allocation2], %s536_s26 }
  0x28   : > { %674 = dma.done.wait (%p759_p6), %s139_s27, 512  }
  0x29   : > { %676 = vsyncadd (%p759_p6), %s139_s27, 4294966784  ;;  %vm170_vm0 = vcmask 130048   ;;  %v169_v0 = vld [vmem:[%s871_s1 + $0x8] sm:$0xff]  ;;  %v168_v1 = vld [vmem:[%s871_s1] sm:$0xff]  ;;  %vm435_vm1 = vcmask 64512   ;;  %s826_s20 = scalar_lea.vmem [#allocation5], %s536_s26 }
  0x2a   : > { %v166_v2 = vld [vmem:[%s142_s28 + $0x10] sm:$0xff]  ;;  %v197_v3 = vand.u32 4294901760, %v169_v0  ;;  %v199_v4 = vand.u32 4294901760, %v168_v1  ;;  %v167_v6 = vld [vmem:[%s142_s28 + $0x18] sm:$0xff]  ;;  %v164_v7 = vld [vmem:[%s142_s28] sm:$0xff]  ;;  %s544_s5 = sshll.u32 %s737_s13, 5 }
  0x2b   : > { %v178_v5 = vsel %vm170_vm0, %v166_v2, 0  ;;  %v165_v8 = vld [vmem:[%s142_s28 + $0x8] sm:$0xff]  ;;  %v181_v10 = vsel %vm170_vm0, %v167_v6, 0  ;;  %v172_v11 = vsel %vm170_vm0, %v164_v7, 0  ;;  %s452_s8 = scalar_lea.hbm %s872_s2, %s544_s5  ;;  %s453_s14 = sshll.u32 %s826_s20, 4  ;;  %s454_s14 = int_to_ptr.vmem [resolvable:$true] %s453_s14 }
  0x2c   : > { %v818_v9 = vand.u32 4294901760, %v178_v5  ;;  %v175_v12 = vsel %vm170_vm0, %v165_v8, 0  ;;  %545 = vmatpush.msra.mxu2 %v197_v3  ;;  %v249_v13 = vsub.f32 %v169_v0, %v197_v3  ;;  %v255_v14 = vsub.f32 %v168_v1, %v199_v4  ;;  %198 = vmatpush.msra.mxu0 %v197_v3  ;;  %s455_s16 = sshll.u32 %s452_s8, 4  ;;  %s441_s13 = scalar_lea.sflag [#allocation4], %s802_s25  ;;  %s456_s16 = int_to_ptr.hbm [resolvable:$true] %s455_s16 }
  0x2d   : > { %v225_v15 = vand.u32 4294901760, %v181_v10  ;;  %v201_v16 = vand.u32 4294901760, %v172_v11  ;;  %v209_v18 = vand.u32 4294901760, %v175_v12  ;;  %s643_s17 = sshra.s32 %s456_s16, 4  ;;  %s649_s26 = scalar_lea.hbm %s872_s2, 64  ;;  %s644_s17 = int_to_ptr.hbm [resolvable:$true] %s643_s17 }
  0x2e   : > { %v218_v17 = vsub.f32 %v178_v5, %v818_v9  ;;  %546 = vmatpush.msra.mxu2 %v199_v4  ;;  %v250_v19 = vand.u32 4294901760, %v249_v13  ;;  %v256_v20 = vand.u32 4294901760, %v255_v14  ;;  %200 = vmatpush.msra.mxu0 %v199_v4  ;;  %s645_s19 = scalar_lea.hbm %s644_s17, 32  ;;  %p650_p0 = scmp.lt.s32.totalorder %s644_s17, %s872_s2 }
  0x2f   : > { %v226_v21 = vsub.f32 %v181_v10, %v225_v15  ;;  %v202_v22 = vsub.f32 %v172_v11, %v201_v16  ;;  %v210_v24 = vsub.f32 %v175_v12, %v209_v18  ;;  %p646_p6 = scmp.ne.s32.totalorder %s644_s17, %s645_s19  ;;  %p651_p1 = scmp.lt.s32.totalorder %s649_s26, %s645_s19 }
  0x30   : > { %v219_v23 = vand.u32 4294901760, %v218_v17  ;;  %293 = vmatpush.msrb.mxu2 %v249_v13  ;;  %v251_v25 = vsub.f32 %v249_v13, %v250_v19  ;;  %v257_v26 = vsub.f32 %v255_v14, %v256_v20  ;;  %378 = vmatpush.msrb.mxu0 %v250_v19 }
  0x31   : > { %v203_v27 = vand.u32 4294901760, %v202_v22  ;;  %v227_v29 = vand.u32 4294901760, %v226_v21  ;;  %v211_v34 = vand.u32 4294901760, %v210_v24  ;;  %p647_p9 = pnand %p646_p6, %p766_p11  ;;  %p652_p3 = por %p651_p1, %p650_p0 }
  0x32   : > { %v220_v28 = vsub.f32 %v218_v17, %v219_v23  ;;  %296 = vmatpush.msrb.mxu2 %v255_v14  ;;  %v252_v30 = vand.u32 4294901760, %v251_v25  ;;  %v258_v31 = vand.u32 4294901760, %v257_v26  ;;  %382 = vmatpush.msrb.mxu0 %v256_v20 }
  0x33   : > { %v204_v32 = vsub.f32 %v202_v22, %v203_v27  ;;  %v228_v36 = vsub.f32 %v226_v21, %v227_v29  ;;  %v212_v37 = vsub.f32 %v210_v24, %v211_v34  ;;  %p648_p13 = pneg %p647_p9 }
  0x34   : > { %v221_v33 = vand.u32 4294901760, %v220_v28  ;;  %547 = vmatpush.msra.mxu3 %v252_v30  ;;  %253 = vmatpush.msra.mxu1 %v252_v30 }
  0x35   : > { %v205_v35 = vand.u32 4294901760, %v204_v32  ;;  %v229_v38 = vand.u32 4294901760, %v228_v36  ;;  %v213_v39 = vand.u32 4294901760, %v212_v37  ;;  %p653_p4 = pnand %p652_p3, %p648_p13 }
  0x36   : > { %222 = vmatmul.f32.vlgmr.msra.gmra.mxu2 %v221_v33  ;;  %548 = vmatpush.msra.mxu3 %v258_v31 }
  0x37   : > { %259 = vmatpush.msra.mxu1 %v258_v31  ;;  %269 = vmatmul.f32.vlgmr.msra.gmra.mxu3 %v818_v9 }
  0x38   : > { %206 = vmatmul.f32.vlgmr.msra.gmra.mxu0 %v205_v35  ;;  %333 = vmatpush.msrb.mxu3 %v197_v3 }
  0x39   : > { %261 = vmatmul.f32.vlgmr.msra.gmra.mxu1 %v201_v16 }
  0x3a   : > { %415 = vmatpush.msrb.mxu1 %v197_v3  ;;  %335 = vmatpush.msrb.mxu3 %v199_v4 }
  0x3c   : > { %417 = vmatpush.msrb.mxu1 %v199_v4 }
  0x3e   : > { %230 = vmatmul.f32.gmra.mxu2 %v229_v38 }
  0x3f   : > { %273 = vmatmul.f32.gmra.mxu3 %v225_v15 }
  0x40   : > { %214 = vmatmul.f32.gmra.mxu0 %v213_v39 }
  0x41   : > { %265 = vmatmul.f32.gmra.mxu1 %v209_v18 }
  0x46   : > { %299 = vmatmul.f32.vlgmr.msrb.gmra.mxu2 %v202_v22 }
  0x47   : > { %339 = vmatmul.f32.vlgmr.msrb.gmra.mxu3 %v203_v27 }
  0x48   : > { %384 = vmatmul.f32.vlgmr.msrb.gmra.mxu0 %v201_v16 }
  0x49   : > { %419 = vmatmul.f32.vlgmr.msrb.gmra.mxu1 %v201_v16 }
  0x4e   : > { %304 = vmatmul.f32.gmra.mxu2 %v210_v24 }
  0x4f   : > { %345 = vmatmul.f32.gmra.mxu3 %v211_v34 }
  0x50   : > { %388 = vmatmul.f32.gmra.mxu0 %v209_v18 }
  0x51   : > { %423 = vmatmul.f32.gmra.mxu1 %v209_v18 }
  0x56   : > { %309 = vmatmul.f32.gmra.mxu2 %v218_v17 }
  0x57   : > { %351 = vmatmul.f32.gmra.mxu3 %v219_v23 }
  0x58   : > { %392 = vmatmul.f32.gmra.mxu0 %v818_v9 }
  0x59   : > { %427 = vmatmul.f32.gmra.mxu1 %v818_v9 }
  0x5e   : > { %314 = vmatmul.f32.gmra.mxu2 %v226_v21 }
  0x5f   : > { %357 = vmatmul.f32.gmra.mxu3 %v227_v29 }
  0x60   : > { %396 = vmatmul.f32.gmra.mxu0 %v225_v15 }
  0x61   : > { %431 = vmatmul.f32.gmra.mxu1 %v225_v15 }
  0xb5   : > { %v207_v40 = vpop.f32.mrf.mxu0 }
  0xb6   : > { %v262_v41 = vpop.f32.mrf.mxu1 }
  0xb7   : > { %v263_v50 = vadd.f32 %v262_v41, %v207_v40 }
  0xb9   : > { %v223_v42 = vpop.f32.mrf.mxu2 }
  0xba   : > { %v270_v43 = vpop.f32.mrf.mxu3 }
  0xbb   : > { %v271_v1 = vadd.f32 %v270_v43, %v223_v42 }
  0xbd   : > { %v215_v44 = vpop.f32.mrf.mxu0 }
  0xbe   : > { %v266_v45 = vpop.f32.mrf.mxu1 }
  0xbf   : > { %v267_v57 = vadd.f32 %v266_v45, %v215_v44 }
  0xc1   : > { %v231_v46 = vpop.f32.mrf.mxu2 }
  0xc2   : > { %v274_v47 = vpop.f32.mrf.mxu3 }
  0xc3   : > { %v275_v10 = vadd.f32 %v274_v47, %v231_v46 }
  0xc5   : > { %v385_v48 = vpop.f32.mrf.mxu0 }
  0xc6   : > { %v420_v49 = vpop.f32.mrf.mxu1 }
  0xc9   : > { %v300_v51 = vpop.f32.mrf.mxu2 }
  0xca   : > { %v301_v52 = vadd.f32 %v300_v51, %v263_v50  ;;  %v340_v53 = vpop.f32.mrf.mxu3 }
  0xcc   : > { %v341_v54 = vadd.f32 %v340_v53, %v301_v52 }
  0xcd   : > { %v389_v56 = vpop.f32.mrf.mxu0 }
  0xce   : > { %v386_v55 = vadd.f32 %v385_v48, %v341_v54  ;;  %v424_v60 = vpop.f32.mrf.mxu1 }
  0xd0   : > { %v421_v58 = vadd.f32 %v420_v49, %v386_v55 }
  0xd1   : > { %v305_v59 = vpop.f32.mrf.mxu2 }
  0xd2   : > { %436 = vst.msk [vmem:[%s826_s20] sm:$0xff] %vm435_vm1, %v421_v58  ;;  %v306_v61 = vadd.f32 %v305_v59, %v267_v57  ;;  %v346_v62 = vpop.f32.mrf.mxu3 }
  0xd4   : > { %v347_v63 = vadd.f32 %v346_v62, %v306_v61 }
  0xd5   : > { %v393_v4 = vpop.f32.mrf.mxu0 }
  0xd6   : > { %v390_v0 = vadd.f32 %v389_v56, %v347_v63  ;;  %v428_v7 = vpop.f32.mrf.mxu1 }
  0xd8   : > { %v425_v2 = vadd.f32 %v424_v60, %v390_v0 }
  0xd9   : > { %v310_v3 = vpop.f32.mrf.mxu2 }
  0xda   : > { %437 = vst.msk [vmem:[%s826_s20 + $0x8] sm:$0xff] %vm435_vm1, %v425_v2  ;;  %v311_v5 = vadd.f32 %v310_v3, %v271_v1  ;;  %v352_v6 = vpop.f32.mrf.mxu3 }
  0xdc   : > { %v353_v8 = vadd.f32 %v352_v6, %v311_v5 }
  0xdd   : > { %v397_v15 = vpop.f32.mrf.mxu0 }
  0xde   : > { %v394_v9 = vadd.f32 %v393_v4, %v353_v8  ;;  %v432_v17 = vpop.f32.mrf.mxu1 }
  0xe0   : > { %v429_v11 = vadd.f32 %v428_v7, %v394_v9 }
  0xe1   : > { %v315_v12 = vpop.f32.mrf.mxu2 }
  0xe2   : > { %438 = vst.msk [vmem:[%s826_s20 + $0x10] sm:$0xff] %vm435_vm1, %v429_v11  ;;  %v316_v13 = vadd.f32 %v315_v12, %v275_v10  ;;  %v358_v14 = vpop.f32.mrf.mxu3 }
  0xe4   : > { %v359_v16 = vadd.f32 %v358_v14, %v316_v13 }
  0xe6   : > { %v398_v18 = vadd.f32 %v397_v15, %v359_v16 }
  0xe8   : > { %v433_v19 = vadd.f32 %v432_v17, %v398_v18 }
  0xea   : > { %439 = vst.msk [vmem:[%s826_s20 + $0x18] sm:$0xff] %vm435_vm1, %v433_v19 }
  0xeb   : > { %656 = shalt.err (!%p653_p4)
}
  0xec   : > { %s699_s25 = smov 128   ;;  %s700_s29 = smov 8  }
  0xed   : > { %551 = dma.vmem_to_hbm [thread:$0]  (%p766_p11), %s454_s14, 512, %s456_s16, %s441_s13, %s699_s25, %s699_s25, %s700_s29  }
  0xee PF: > { %s470_s30 = sand.u32 1, %s683_s9   ;;  %p878_p7 = scmp.ge.s32.totalorder %s695_s12, 2 }
  0xef   : > { %s471_s3 = scalar_lea.sflag [#allocation4], %s470_s30 }
  0xf0   : > { %p558_p5 = pnand %p878_p7, %p770_p12 }
  0xf2   : > { %p559_p8 = pneg %p558_p5 }
  0xf4   : > { %678 = dma.done.wait (%p559_p8), %s471_s3, 512  }
  0xf5   : > { %680 = vsyncadd (%p559_p8), %s471_s3, 4294966784  ;;  %p15_p10 = scmp.ge.s32.totalorder %s741_s15, 4   ;;  %s879_s9 = smov %s687_s10 }
  0xf6   : > { %s880_s10 = smov %s691_s11  ;;  %s881_s11 = smov %s753_s18 }
  0xf7   : > { %s882_s12 = smov %s741_s15  ;;  %17 = sbr.rel (!%p15_p10) target bundleno = 5 (0x5), region = 73 }
  0xfc   :  { %477 = vsyncpa [#allocation3], 1 }
  0xfd   :  { %479 = vsyncpa [#allocation3 + $0x1], 1 }
  0xfe   :  { %480 = vsyncpa [#allocation4], 1 }
  0xff   :  { %482 = vsyncpa [#allocation4 + $0x1], 1 }

</bundles_post_ra>
